<compile_context>
chip_gen: v7x
topology: tpu7x:2x2x1
jax: 0.10.0
libtpu: 0.0.40
codegen_flags: <defaults>
</compile_context>

<pallas_src>
import math

import jax
import jax.numpy as jnp
from jax.experimental import pallas as pl
from jax.experimental.pallas import tpu as pltpu


# -----------------------------------------------------------------------------
# Init-time buffers (mirror register_buffer / Conv1d init in the PyTorch module).
# -----------------------------------------------------------------------------
def prepare_embedding(dim: int, max_iter: int, scale: float = 5000.0) -> jax.Array:
    """Matches SinusoidalPositionalEncoding.prepare_embedding -> (max_iter, dim)."""
    assert dim % 2 == 0
    dim_h = dim // 2
    pos = jnp.linspace(0.0, scale, max_iter, dtype=jnp.float32)                  # (max_iter,)
    div_term = jnp.exp(-math.log(10000.0)
                       * jnp.arange(dim_h, dtype=jnp.float32) / dim_h)           # (dim_h,)
    ang = pos[:, None] * div_term[None, :]                                       # (max_iter, dim_h)
    return jnp.concatenate([jnp.sin(ang), jnp.cos(ang)], axis=-1)                # (max_iter, dim)


def init_pe_table(dim: int, max_iter: int, conv_w=None, conv_b=None,
                  table_dtype=jnp.float32, scale: float = 5000.0) -> jax.Array:
    """Build the (max_iter, dim, 1) positional-embedding table ONCE at init.

    If conv_w / conv_b (the 1x1 Conv1d of use_conv=True) are given, the conv is
    folded into the table: conv(pe[t][None, :, None]) == W @ pe[t] + b, so the
    transformed table is  pos_embs @ W.T + b.  This hoists the O(dim^2) matvec
    out of the per-tile grid entirely (forward-only fold; if the conv weights
    are being trained, re-run this tiny matmul after each weight update).

    The trailing size-1 minor dim makes the selected row land as (dim, 1), so
    the in-kernel broadcast-add runs along the lane (T) axis with no relayout.
    """
    pe = prepare_embedding(dim, max_iter, scale)                                 # (max_iter, dim)
    if conv_w is not None:
        w = jnp.asarray(conv_w, jnp.float32).reshape(dim, dim)
        b = (jnp.zeros((dim,), jnp.float32) if conv_b is None
             else jnp.asarray(conv_b, jnp.float32).reshape(dim))
        pe = pe @ w.T + b[None, :]
    return pe.astype(table_dtype).reshape(max_iter, dim, 1)


# -----------------------------------------------------------------------------
# Kernel.  Scalar-prefetch ref (t) arrives first; row selection already happened
# in the pos BlockSpec index_map, so the body is a pure broadcast-add.
# -----------------------------------------------------------------------------
def _pe_add_kernel(t_sref, x_ref, pos_ref, o_ref):
    del t_sref
    xv = x_ref[...]                 # (bB, dim, tT)
    pe = pos_ref[...]               # (1, dim, 1) -> broadcasts over batch & lanes
    if xv.dtype == pe.dtype:
        # Native-dtype add (bf16 VPU on v6e/v7x): no cast filler, half the vregs.
        o_ref[...] = xv + pe
    else:
        # Mixed dtypes: accumulate in f32, cast only at the store (v5e-safe).
        o_ref[...] = (xv.astype(jnp.float32)
                      + pe.astype(jnp.float32)).astype(o_ref.dtype)


# -----------------------------------------------------------------------------
# Tiling: byte-targeted blocks.  HBM-bound kernel -> the only costs are DMA
# bytes and the ~0.35 us per-grid-step overhead, so aim for ~2 MiB x-blocks.
# -----------------------------------------------------------------------------
def _pick_tiling(B: int, dim: int, T: int, itemsize: int):
    """Returns (bB, tT): block sizes along batch and time."""
    TARGET = 2 << 20   # ~2 MiB per x block; double-buffered in+out ~8 MiB,
                       # well under the v7x 32 MiB scoped-VMEM default.
    whole = B * dim * T * itemsize
    if whole <= TARGET:
        # Small input: single block.  Launch/step-overhead-bound regardless, so
        # fold all of B (and T) into one block (masked stores accepted here).
        return B, T
    per_row = dim * T * itemsize
    if per_row <= TARGET:
        # Rows are small: fold several batch rows per block instead of tiling T
        # (keeps lane width = T and each block near TARGET bytes).
        bB = int(max(1, min(B, TARGET // per_row)))
        return bB, T
    # Large rows: one batch row per block, lane-dense 128-multiple T tiles.
    tT = (TARGET // (dim * itemsize)) // 128 * 128
    tT = int(max(128, min(tT, 2048)))
    if tT >= T:
        tT = T
    return 1, tT


# -----------------------------------------------------------------------------
# Forward wrapper (mirrors SinusoidalPositionalEncoding.forward).
# -----------------------------------------------------------------------------
def sinusoidal_pe_forward(x, t, pe_table, *, donate_x: bool = False):
    """x: (B, dim, T); t: step index (python int or traced int32);
    pe_table: (max_iter, dim, 1) from init_pe_table() (conv already folded in
    for the use_conv=True path)."""
    B, dim, T = x.shape
    assert pe_table.ndim == 3 and pe_table.shape[1:] == (dim, 1), pe_table.shape
    max_iter = pe_table.shape[0]
    if isinstance(t, int):
        assert 0 <= t < max_iter, f"Invalid step index {t}."
    # Clamp so an out-of-range traced t cannot drive the pos DMA out of bounds.
    t_arr = jnp.clip(jnp.asarray(t, dtype=jnp.int32), 0, max_iter - 1).reshape((1,))

    bB, tT = _pick_tiling(B, dim, T, jnp.dtype(x.dtype).itemsize)
    grid = (pl.cdiv(B, bB), pl.cdiv(T, tT))

    x_spec = pl.BlockSpec((bB, dim, tT), lambda b, j, t_ref: (b, 0, j))
    pos_spec = pl.BlockSpec((1, dim, 1), lambda b, j, t_ref: (t_ref[0], 0, 0))
    out_spec = pl.BlockSpec((bB, dim, tT), lambda b, j, t_ref: (b, 0, j))

    return pl.pallas_call(
        _pe_add_kernel,
        out_shape=jax.ShapeDtypeStruct((B, dim, T), x.dtype),
        grid_spec=pltpu.PrefetchScalarGridSpec(
            num_scalar_prefetch=1,
            grid=grid,
            in_specs=[x_spec, pos_spec],
            out_specs=out_spec,
        ),
        compiler_params=pltpu.CompilerParams(
            dimension_semantics=("parallel", "parallel"),
        ),
        # x is flat operand 1 (after the scalar-prefetch t); aliasing removes the
        # extra (B, dim, T) HBM allocation when the caller can donate x.
        input_output_aliases=({1: 0} if donate_x else {}),
    )(t_arr, x, pe_table)


# -----------------------------------------------------------------------------
# Test.
# -----------------------------------------------------------------------------
if __name__ == "__main__":
    key = jax.random.PRNGKey(0)
    kx, kw, kx2, kx3 = jax.random.split(key, 4)

    # ---- Small-shape use_conv=False path (f32) ----
    B, dim, T, max_iter = 2, 32, 16, 8
    t = 3
    x = jax.random.normal(kx, (B, dim, T), dtype=jnp.float32)
    pos_embs = prepare_embedding(dim, max_iter)                      # (max_iter, dim)
    pe_table = init_pe_table(dim, max_iter)                          # (max_iter, dim, 1)

    out = sinusoidal_pe_forward(x, t, pe_table)
    jax.block_until_ready(out)
    ref = x + pos_embs[t][None, :, None]
    assert out.shape == (B, dim, T) and out.dtype == x.dtype
    assert jnp.allclose(out, ref, atol=1e-5, rtol=1e-5), "no-conv path mismatch"

    # ---- Small-shape use_conv=True path (conv folded into the table at init) ----
    limit = math.sqrt(6.0 / (dim + dim))                             # xavier-uniform
    conv_w = jax.random.uniform(kw, (dim, dim), jnp.float32, -limit, limit)
    conv_b = jnp.zeros((dim,), jnp.float32)                          # zero bias (like PyTorch init)
    pe_table_conv = init_pe_table(dim, max_iter, conv_w, conv_b)

    out_c = sinusoidal_pe_forward(x, t, pe_table_conv)
    jax.block_until_ready(out_c)
    ref_c = x + (conv_w @ pos_embs[t] + conv_b)[None, :, None]
    assert jnp.allclose(out_c, ref_c, atol=1e-3, rtol=1e-3), "conv path mismatch"

    # ---- bf16 path: native-dtype add (no f32 casts on v6e/v7x) ----
    xb = jax.random.normal(kx2, (B, dim, T), dtype=jnp.float32).astype(jnp.bfloat16)
    pe_table_bf16 = init_pe_table(dim, max_iter, table_dtype=jnp.bfloat16)
    out_b = sinusoidal_pe_forward(xb, t, pe_table_bf16)
    jax.block_until_ready(out_b)
    ref_b = (xb.astype(jnp.float32) + pos_embs[t][None, :, None]).astype(jnp.bfloat16)
    assert out_b.dtype == jnp.bfloat16
    assert jnp.allclose(out_b.astype(jnp.float32), ref_b.astype(jnp.float32),
                        atol=2e-2, rtol=2e-2), "bf16 path mismatch"

    # ---- Larger shape: exercises lane-dense T tiling + masked edge tile ----
    B2, dim2, T2 = 1, 256, 4500                                      # ~4.4 MiB -> 2048-lane tiles
    x2 = jax.random.normal(kx3, (B2, dim2, T2), dtype=jnp.float32)
    pos_embs2 = prepare_embedding(dim2, max_iter)
    pe_table2 = init_pe_table(dim2, max_iter)
    out2 = sinusoidal_pe_forward(x2, t, pe_table2)
    jax.block_until_ready(out2)
    ref2 = x2 + pos_embs2[t][None, :, None]
    assert jnp.allclose(out2, ref2, atol=1e-5, rtol=1e-5), "tiled path mismatch"

    print("KERNEL_OK")
</pallas_src>

<mosaic_0001>
module attributes {stable_mosaic.version = 11 : i64} {
  func.func @_pe_add_kernel(%arg0: i32, %arg1: i32, %arg2: memref<1xi32, #tpu.memory_space<smem>>, %arg3: memref<2x32x16xf32, #tpu.memory_space<vmem>>, %arg4: memref<1x32x1xf32, #tpu.memory_space<vmem>>, %arg5: memref<2x32x16xf32, #tpu.memory_space<vmem>>) attributes {dimension_semantics = [#tpu.dimension_semantics<parallel>, #tpu.dimension_semantics<parallel>], iteration_bounds = array<i64: 1, 1>, scalar_prefetch = 1 : i64, scratch_operands = 0 : i64, tpu.core_type = #tpu.core_type<tc>, window_params = [{transform_indices = @transform_0, window_bounds = array<i64: 2, 32, 16>}, {transform_indices = @transform_1, window_bounds = array<i64: 1, 32, 1>}, {transform_indices = @transform_2, window_bounds = array<i64: 2, 32, 16>}]} {
    %c0 = arith.constant 0 : index
    %c0_0 = arith.constant 0 : index
    %c0_1 = arith.constant 0 : index
    %0 = vector.load %arg3[%c0, %c0_0, %c0_1] : memref<2x32x16xf32, #tpu.memory_space<vmem>>, vector<2x32x16xf32>
    %c0_2 = arith.constant 0 : index
    %c0_3 = arith.constant 0 : index
    %c0_4 = arith.constant 0 : index
    %1 = vector.load %arg4[%c0_2, %c0_3, %c0_4] : memref<1x32x1xf32, #tpu.memory_space<vmem>>, vector<1x32x1xf32>
    %2 = vector.broadcast %1 : vector<1x32x1xf32> to vector<2x32x16xf32>
    %3 = arith.addf %0, %2 : vector<2x32x16xf32>
    %c0_5 = arith.constant 0 : index
    %c0_6 = arith.constant 0 : index
    %c0_7 = arith.constant 0 : index
    %4 = vector.load %arg5[%c0_5, %c0_6, %c0_7] : memref<2x32x16xf32, #tpu.memory_space<vmem>>, vector<2x32x16xf32>
    tpu.vector_store %arg5[%c0_5, %c0_6, %c0_7], %3 {strides = array<i32>} : memref<2x32x16xf32, #tpu.memory_space<vmem>>, vector<2x32x16xf32>,
    return
  }
  func.func @transform_0(%arg0: i32, %arg1: i32, %arg2: memref<1xi32, #tpu.memory_space<smem>>) -> (i32, i32, i32) {
    %c0_i32 = arith.constant 0 : i32
    %c0_i32_0 = arith.constant 0 : i32
    return %arg0, %c0_i32, %arg1 : i32, i32, i32
  }
  func.func @transform_1(%arg0: i32, %arg1: i32, %arg2: memref<1xi32, #tpu.memory_space<smem>>) -> (i32, i32, i32) {
    %c0 = arith.constant 0 : index
    %0 = memref.load %arg2[%c0] : memref<1xi32, #tpu.memory_space<smem>>
    %c0_i32 = arith.constant 0 : i32
    %c0_i32_0 = arith.constant 0 : i32
    %c0_i32_1 = arith.constant 0 : i32
    return %0, %c0_i32, %c0_i32_0 : i32, i32, i32
  }
  func.func @transform_2(%arg0: i32, %arg1: i32, %arg2: memref<1xi32, #tpu.memory_space<smem>>) -> (i32, i32, i32) {
    %c0_i32 = arith.constant 0 : i32
    %c0_i32_0 = arith.constant 0 : i32
    return %arg0, %c0_i32, %arg1 : i32, i32, i32
  }
}

</mosaic_0001>

<bundles_post_ra>
// kernel: tpu_custom_call.1
= control target key start
LH: loop header
LB: loop body
LE: loop exit
PB: predicated region body
PF: predicated region fallthrough
CT: control target
= control target key end

     0   :  { %v98_v0 = vmov 0   ;;  %vm73_vm0 = vcmask 130048   ;;  %s184_s0 = inlined_call_operand.<no memory space> [shape: s32[1], index: 0, kind: input, shape index: {}]   ;;  %s185_s2 = inlined_call_operand.vmem [shape: f32[8,32,1], index: 2, kind: input, shape index: {}]   ;;  %s186_s1 = inlined_call_operand.vmem [shape: f32[2,32,16], index: 1, kind: input, shape index: {}]   ;;  %s187_s3 = inlined_call_operand.vmem [shape: f32[2,32,16], index: 3, kind: output, shape index: {}]  }
   0x1   :  { %97 = vset.pattern.permute.xlu1 %v98_v0  ;;  %96 = vset.pattern.permute.xlu0 %v98_v0  ;;  %p27_p0 = scmp.lt.s32.totalorder %s184_s0, 7  ;;  %v35_v5 = vld [vmem:[%s186_s1 + $0x10] sm:$0xff]  ;;  %v33_v7 = vld [vmem:[%s186_s1] sm:$0xff]  ;;  %v36_v15 = vld [vmem:[%s186_s1 + $0x18] sm:$0xff] }
   0x2   :  { %v39_v6 = vld [vmem:[%s186_s1 + $0x30] sm:$0xff]  ;;  %v37_v8 = vld [vmem:[%s186_s1 + $0x20] sm:$0xff]  ;;  %v40_v16 = vld [vmem:[%s186_s1 + $0x38] sm:$0xff] }
   0x3   :  { %s189_s0 = smov (!%p27_p0, %s184_s0), 7  ;;  %v34_v17 = vld [vmem:[%s186_s1 + $0x8] sm:$0xff] }
   0x4   :  { %s94_s16 = sshll.u32 %s189_s0, 5  ;;  %v38_v18 = vld [vmem:[%s186_s1 + $0x28] sm:$0xff] }
   0x5   :  { %s31_s19 = scalar_lea.vmem %s185_s2, %s94_s16 }
   0x6   :  { %v43_v1 = vld [vmem:[%s31_s19 + $0x10] sm:$0xff]  ;;  %v41_v2 = vld [vmem:[%s31_s19] sm:$0xff]  ;;  %v44_v3 = vld [vmem:[%s31_s19 + $0x18] sm:$0xff] }
   0x7   :  { %57 = vperm.xlu1 %97, %v43_v1   ;;  %47 = vperm.xlu0 %96, %v41_v2   ;;  %v42_v4 = vld [vmem:[%s31_s19 + $0x8] sm:$0xff] }
   0xb   :  { %62 = vperm.xlu1 %97, %v44_v3   ;;  %52 = vperm.xlu0 %96, %v42_v4  }
  0x86   :  { %v58_v9 = vpop.permute.xlu1 %57  ;;  %v48_v10 = vpop.permute.xlu0 %47 }
  0x87   :  { %v67_v11 = vadd.f32 %v58_v9, %v35_v5  ;;  %v71_v12 = vadd.f32 %v58_v9, %v39_v6  ;;  %v65_v13 = vadd.f32 %v48_v10, %v33_v7  ;;  %v69_v14 = vadd.f32 %v48_v10, %v37_v8 }
  0x89   :  { %76 = vst.msk [vmem:[%s187_s3 + $0x10] sm:$0xff] %vm73_vm0, %v67_v11  ;;  %80 = vst.msk [vmem:[%s187_s3 + $0x30] sm:$0xff] %vm73_vm0, %v71_v12 }
  0x8a   :  { %74 = vst.msk [vmem:[%s187_s3] sm:$0xff] %vm73_vm0, %v65_v13  ;;  %78 = vst.msk [vmem:[%s187_s3 + $0x20] sm:$0xff] %vm73_vm0, %v69_v14  ;;  %v63_v19 = vpop.permute.xlu1 %62  ;;  %v53_v20 = vpop.permute.xlu0 %52 }
  0x8b   :  { %v68_v21 = vadd.f32 %v63_v19, %v36_v15  ;;  %v72_v22 = vadd.f32 %v63_v19, %v40_v16  ;;  %v66_v23 = vadd.f32 %v53_v20, %v34_v17  ;;  %v70_v24 = vadd.f32 %v53_v20, %v38_v18 }
  0x8d   :  { %77 = vst.msk [vmem:[%s187_s3 + $0x18] sm:$0xff] %vm73_vm0, %v68_v21  ;;  %81 = vst.msk [vmem:[%s187_s3 + $0x38] sm:$0xff] %vm73_vm0, %v72_v22 }
  0x8e   :  { %75 = vst.msk [vmem:[%s187_s3 + $0x8] sm:$0xff] %vm73_vm0, %v66_v23  ;;  %79 = vst.msk [vmem:[%s187_s3 + $0x28] sm:$0xff] %vm73_vm0, %v70_v24 }

</bundles_post_ra>
